<compile_context>
chip_gen: v5e
topology: v5e:2x2
jax: 0.10.0
libtpu: 0.0.40
codegen_flags: <defaults>
</compile_context>

<pallas_src>
import jax
import jax.numpy as jnp
from jax.experimental import pallas as pl
from jax.experimental.pallas import tpu as pltpu


# ------------------------------ kernel body ---------------------------------

def _residual_layer_kernel(x_ref, w1_ref, b1_ref, w2_ref, b2_ref, o_ref):
    x = x_ref[...]                                   # (tm, H_pad), input dtype
    mm_dtype = w1_ref.dtype                          # MXU operand dtype

    # lin1: MXU matmul (f32 accumulate) + bias + swish (sigmoid on the EUP).
    h1 = jnp.dot(x.astype(mm_dtype), w1_ref[...],
                 preferred_element_type=jnp.float32) + b1_ref[...]
    h1 = h1 * jax.nn.sigmoid(h1)

    # lin2
    h2 = jnp.dot(h1.astype(mm_dtype), w2_ref[...],
                 preferred_element_type=jnp.float32) + b2_ref[...]
    h2 = h2 * jax.nn.sigmoid(h2)

    # residual add in f32 against the un-cast input
    o_ref[...] = (x.astype(jnp.float32) + h2).astype(o_ref.dtype)


# ------------------------------- helpers -------------------------------------

def _round_up(a, b):
    return ((a + b - 1) // b) * b


def _cdiv(a, b):
    return (a + b - 1) // b


def _resident_spec_factory():
    """Grid-invariant (resident) BlockSpec factory + its VMEM buffer count."""
    try:
        pl.BlockSpec((8, 128), lambda i: (0, 0),
                     pipeline_mode=pl.Buffered(buffer_count=1))

        def factory(shape):
            return pl.BlockSpec(shape, lambda i: (0,) * len(shape),
                                pipeline_mode=pl.Buffered(buffer_count=1))
        return factory, 1
    except (TypeError, ValueError):
        # Older JAX without pipeline_mode: default (double) buffering — account
        # for it in the VMEM budget so tm stays honest.
        def factory(shape):
            return pl.BlockSpec(shape, lambda i: (0,) * len(shape))
        return factory, 2


_RESIDENT_SPEC, _WEIGHT_BUFFERS = _resident_spec_factory()


def _vmem_policy():
    """(vmem_limit cap, auto-tile budget) in bytes, generation aware."""
    try:
        phys = int(pltpu.get_tpu_info().vmem_capacity_bytes)
    except Exception:
        phys = 64 << 20                       # conservative: v7x per-TC VMEM
    if phys >= (96 << 20):                    # v5e / v6e: 128 MiB physical
        return 108 << 20, 96 << 20
    return 54 << 20, 44 << 20                 # v7x: 64 MiB per TensorCore


# ------------------------------ wrappers --------------------------------------

def prepare_residual_params(w1_t, b1, w2_t, b2, *, matmul_dtype=None):
    """Pad the hidden dim to a multiple of 128 and cast the MXU operands.

    Hoist / cache the result when calling the layer repeatedly (small-batch
    inference): it otherwise re-reads both HxH weight matrices every call.

    matmul_dtype: None -> bf16 MXU operands (f32 accumulate, default);
                  jnp.float32 -> exact f32 matmuls.
    """
    H = w1_t.shape[0]
    H_pad = _round_up(H, 128)
    mm_dtype = jnp.dtype(jnp.bfloat16 if matmul_dtype is None else matmul_dtype)

    if mm_dtype == jnp.dtype(jnp.float32):
        limit_cap, _ = _vmem_policy()
        w_bytes_f32 = _WEIGHT_BUFFERS * 2 * H_pad * H_pad * 4
        if w_bytes_f32 > limit_cap - (8 << 20):
            # Resident f32 weights would not fit VMEM alongside a row tile.
            # TODO(synk): add a column/K-tiled weight path for very large H
            # instead of forcing bf16 operands.
            mm_dtype = jnp.dtype(jnp.bfloat16)

    w1_t = w1_t.astype(mm_dtype)
    w2_t = w2_t.astype(mm_dtype)
    b1 = b1.reshape(1, H).astype(jnp.float32)
    b2 = b2.reshape(1, H).astype(jnp.float32)
    if H_pad != H:
        dh = H_pad - H
        # Zero weight rows/cols + zero biases keep padded output columns
        # exactly 0 through both swish layers and the residual.
        w1_t = jnp.pad(w1_t, ((0, dh), (0, dh)))
        w2_t = jnp.pad(w2_t, ((0, dh), (0, dh)))
        b1 = jnp.pad(b1, ((0, 0), (0, dh)))
        b2 = jnp.pad(b2, ((0, 0), (0, dh)))
    return dict(H=H, H_pad=H_pad, mm_dtype=mm_dtype,
                w1_t=w1_t, b1=b1, w2_t=w2_t, b2=b2)


def residual_layer_prepared(x, params, *, tm=None, vmem_budget_bytes=None):
    """x: [N, H]; params: output of prepare_residual_params."""
    N, H = x.shape
    assert H == params["H"], "hidden size mismatch"
    H_pad = params["H_pad"]
    w1_t, b1, w2_t, b2 = params["w1_t"], params["b1"], params["w2_t"], params["b2"]
    out_dtype = x.dtype

    # Lane-dense hidden dim: pad x's COLUMNS only (rows are never padded).
    x_k = jnp.pad(x, ((0, 0), (0, H_pad - H))) if H_pad != H else x

    itemsize = jnp.dtype(x.dtype).itemsize
    mm_itemsize = jnp.dtype(params["mm_dtype"]).itemsize
    w_itemsize = jnp.dtype(w1_t.dtype).itemsize

    limit_cap, auto_budget = _vmem_policy()
    budget = auto_budget if vmem_budget_bytes is None else int(vmem_budget_bytes)
    budget = min(budget, limit_cap)

    # Resident weights + biases (single-buffered when pipeline_mode exists).
    weight_bytes = _WEIGHT_BUFFERS * (2 * H_pad * H_pad * w_itemsize
                                      + 2 * H_pad * 4)

    # Per extra row of the tile:
    #   x tile + out tile (each double-buffered), f32 h1/h2, matmul-dtype
    #   casts of x and h1, and an f32 copy of x for the residual if x != f32.
    per_row = (2 * H_pad * itemsize           # x tile (double-buffered)
               + 2 * H_pad * itemsize         # out tile (double-buffered)
               + 2 * H_pad * 4                # f32 h1 / h2
               + 2 * H_pad * mm_itemsize      # casts of x and h1 for the MXU
               + (H_pad * 4 if itemsize != 4 else 0))

    # ---- Row tile: as large as fits VMEM, then evened out across the grid ----
    if tm is None:
        avail = budget - weight_bytes - (2 << 20)
        tm_max = avail // per_row if avail > 0 else 8
        # Bigger caps for small hidden sizes (the tiles stay small anyway).
        tm_cap = 4096 if H_pad <= 256 else (2048 if H_pad <= 512 else 1024)
        tm_max = max(8, min(int(tm_max), tm_cap))
    else:
        tm_max = max(8, int(tm))
    tm_max = max(8, (tm_max // 8) * 8)

    if N <= 8:
        tm_eff = N                            # full-dim block (allowed)
    else:
        # >= 4 steps when N allows (>= 2 per v7x core under "parallel"),
        # and even-sized tiles so the last partial block isn't mostly waste.
        min_steps = 4 if N >= 32 else 1
        steps = max(_cdiv(N, tm_max), min_steps)
        tm_eff = max(8, _round_up(_cdiv(N, steps), 8))

    grid = (_cdiv(N, tm_eff),)

    vmem_needed = weight_bytes + per_row * tm_eff + (4 << 20)
    vmem_limit = int(min(max(vmem_needed, 16 << 20), limit_cap))

    cost = pl.CostEstimate(
        flops=4 * N * H_pad * H_pad,                   # two NxHxH matmuls
        transcendentals=2 * N * H_pad,                 # two sigmoids
        bytes_accessed=2 * N * H_pad * itemsize        # x read + out write
                       + 2 * H_pad * H_pad * w_itemsize,
    )

    out = pl.pallas_call(
        _residual_layer_kernel,
        out_shape=jax.ShapeDtypeStruct((N, H_pad), out_dtype),
        grid_spec=pltpu.PrefetchScalarGridSpec(
            num_scalar_prefetch=0,
            grid=grid,
            in_specs=[
                pl.BlockSpec((tm_eff, H_pad), lambda i: (i, 0)),   # x tile
                _RESIDENT_SPEC((H_pad, H_pad)),                    # W1^T
                _RESIDENT_SPEC((1, H_pad)),                        # b1
                _RESIDENT_SPEC((H_pad, H_pad)),                    # W2^T
                _RESIDENT_SPEC((1, H_pad)),                        # b2
            ],
            out_specs=pl.BlockSpec((tm_eff, H_pad), lambda i: (i, 0)),
        ),
        compiler_params=pltpu.CompilerParams(
            dimension_semantics=("parallel",),
            vmem_limit_bytes=vmem_limit,
        ),
        cost_estimate=cost,
    )(x_k, w1_t, b1, w2_t, b2)

    # Slice only along H (no row padding was added).
    return out[:, :H] if H_pad != H else out


def residual_layer(x, w1_t, b1, w2_t, b2, *, tm=None, matmul_dtype=None,
                   vmem_budget_bytes=None):
    """x: [N, H]; w*_t: [H, H] pre-transposed, i.e. y = x @ w_t + b."""
    params = prepare_residual_params(w1_t, b1, w2_t, b2,
                                     matmul_dtype=matmul_dtype)
    return residual_layer_prepared(x, params, tm=tm,
                                   vmem_budget_bytes=vmem_budget_bytes)


def residual_layer_ref(x, w1_t, b1, w2_t, b2):
    """Pure-JAX reference for correctness checking."""
    h1 = jax.nn.silu(x @ w1_t + b1)
    h2 = jax.nn.silu(h1 @ w2_t + b2)
    return x + h2


if __name__ == "__main__":
    # Small shapes consistent with the module (hidden_channels = H).
    # N is NOT a multiple of the row tile and H is NOT a multiple of 128, so
    # the partial-last-block path and the column-padding path are exercised.
    N, H = 200, 64
    key = jax.random.PRNGKey(0)
    kx, kw1, kb1, kw2, kb2 = jax.random.split(key, 5)

    x = jax.random.normal(kx, (N, H), dtype=jnp.float32)

    # PyTorch Linear stores weight as [out, in]; we build the transpose
    # [in, out] directly so the kernel computes x @ W_t + b.
    scale = 1.0 / jnp.sqrt(H)
    w1_t = jax.random.uniform(kw1, (H, H), jnp.float32, -scale, scale)
    b1 = jax.random.uniform(kb1, (H,), jnp.float32, -scale, scale)
    w2_t = jax.random.uniform(kw2, (H, H), jnp.float32, -scale, scale)
    b2 = jax.random.uniform(kb2, (H,), jnp.float32, -scale, scale)

    ref = residual_layer_ref(x, w1_t, b1, w2_t, b2)

    # Exact f32 matmul path.
    out_f32 = jax.block_until_ready(
        residual_layer(x, w1_t, b1, w2_t, b2, matmul_dtype=jnp.float32))
    assert out_f32.shape == (N, H)
    assert jnp.allclose(out_f32, ref, atol=1e-5, rtol=1e-5)

    # Default path: bf16 MXU operands, f32 accumulate / bias / swish / residual.
    out_def = jax.block_until_ready(residual_layer(x, w1_t, b1, w2_t, b2))
    assert out_def.shape == (N, H)
    assert jnp.allclose(out_def, ref, atol=5e-2, rtol=5e-2)

    # Hoisted-weights path (prepare once, apply many times).
    params = jax.tree_util.tree_map(jax.block_until_ready,
                                    prepare_residual_params(w1_t, b1, w2_t, b2))
    out_prep = jax.block_until_ready(residual_layer_prepared(x, params))
    assert jnp.allclose(out_prep, ref, atol=5e-2, rtol=5e-2)

    print("KERNEL_OK")
</pallas_src>

<mosaic_0001>
module attributes {stable_mosaic.version = 11 : i64} {
  func.func @_residual_layer_kernel(%arg0: i32, %arg1: memref<56x128xf32, #tpu.memory_space<vmem>>, %arg2: memref<128x128xf32, #tpu.memory_space<vmem>>, %arg3: memref<1x128xf32, #tpu.memory_space<vmem>>, %arg4: memref<128x128xf32, #tpu.memory_space<vmem>>, %arg5: memref<1x128xf32, #tpu.memory_space<vmem>>, %arg6: memref<56x128xf32, #tpu.memory_space<vmem>>) attributes {dimension_semantics = [#tpu.dimension_semantics<parallel>], iteration_bounds = array<i64: 4>, scalar_prefetch = 0 : i64, scratch_operands = 0 : i64, tpu.core_type = #tpu.core_type<tc>, window_params = [{transform_indices = @transform_0, window_bounds = array<i64: 56, 128>}, {pipeline_mode = #tpu.pipeline_mode<synchronous>, transform_indices = @transform_1, window_bounds = array<i64: 128, 128>}, {pipeline_mode = #tpu.pipeline_mode<synchronous>, transform_indices = @transform_2, window_bounds = array<i64: 1, 128>}, {pipeline_mode = #tpu.pipeline_mode<synchronous>, transform_indices = @transform_3, window_bounds = array<i64: 128, 128>}, {pipeline_mode = #tpu.pipeline_mode<synchronous>, transform_indices = @transform_4, window_bounds = array<i64: 1, 128>}, {transform_indices = @transform_5, window_bounds = array<i64: 56, 128>}]} {
    %c0 = arith.constant 0 : index
    %c0_0 = arith.constant 0 : index
    %0 = vector.load %arg1[%c0, %c0_0] : memref<56x128xf32, #tpu.memory_space<vmem>>, vector<56x128xf32>
    %c0_1 = arith.constant 0 : index
    %c0_2 = arith.constant 0 : index
    %1 = vector.load %arg2[%c0_1, %c0_2] : memref<128x128xf32, #tpu.memory_space<vmem>>, vector<128x128xf32>
    %cst = arith.constant dense<0.000000e+00> : vector<56x128xf32>
    %2 = tpu.matmul %0, %1, %cst {dimension_numbers = #tpu.dot_dimension_numbers<[1], [0], [0], [1], [0, 0, 1, 1], [], []>} : vector<56x128xf32>, vector<128x128xf32>, vector<56x128xf32> -> vector<56x128xf32>
    %c0_3 = arith.constant 0 : index
    %c0_4 = arith.constant 0 : index
    %3 = vector.load %arg3[%c0_3, %c0_4] : memref<1x128xf32, #tpu.memory_space<vmem>>, vector<1x128xf32>
    %4 = vector.broadcast %3 : vector<1x128xf32> to vector<56x128xf32>
    %5 = arith.addf %2, %4 : vector<56x128xf32>
    %6 = arith.negf %5 : vector<56x128xf32>
    %7 = math.exp %6 : vector<56x128xf32>
    %cst_5 = arith.constant 1.000000e+00 : f32
    %8 = vector.broadcast %cst_5 : f32 to vector<56x128xf32>
    %9 = arith.addf %8, %7 : vector<56x128xf32>
    %10 = arith.divf %8, %9 : vector<56x128xf32>
    %11 = arith.mulf %5, %10 : vector<56x128xf32>
    %c0_6 = arith.constant 0 : index
    %c0_7 = arith.constant 0 : index
    %12 = vector.load %arg4[%c0_6, %c0_7] : memref<128x128xf32, #tpu.memory_space<vmem>>, vector<128x128xf32>
    %cst_8 = arith.constant dense<0.000000e+00> : vector<56x128xf32>
    %13 = tpu.matmul %11, %12, %cst_8 {dimension_numbers = #tpu.dot_dimension_numbers<[1], [0], [0], [1], [0, 0, 1, 1], [], []>} : vector<56x128xf32>, vector<128x128xf32>, vector<56x128xf32> -> vector<56x128xf32>
    %c0_9 = arith.constant 0 : index
    %c0_10 = arith.constant 0 : index
    %14 = vector.load %arg5[%c0_9, %c0_10] : memref<1x128xf32, #tpu.memory_space<vmem>>, vector<1x128xf32>
    %15 = vector.broadcast %14 : vector<1x128xf32> to vector<56x128xf32>
    %16 = arith.addf %13, %15 : vector<56x128xf32>
    %17 = arith.negf %16 : vector<56x128xf32>
    %18 = math.exp %17 : vector<56x128xf32>
    %cst_11 = arith.constant 1.000000e+00 : f32
    %19 = vector.broadcast %cst_11 : f32 to vector<56x128xf32>
    %20 = arith.addf %19, %18 : vector<56x128xf32>
    %21 = arith.divf %19, %20 : vector<56x128xf32>
    %22 = arith.mulf %16, %21 : vector<56x128xf32>
    %23 = arith.addf %0, %22 : vector<56x128xf32>
    %c0_12 = arith.constant 0 : index
    %c0_13 = arith.constant 0 : index
    %24 = vector.load %arg6[%c0_12, %c0_13] : memref<56x128xf32, #tpu.memory_space<vmem>>, vector<56x128xf32>
    tpu.vector_store %arg6[%c0_12, %c0_13], %23 {strides = array<i32>} : memref<56x128xf32, #tpu.memory_space<vmem>>, vector<56x128xf32>,
    return
  }
  func.func @transform_0(%arg0: i32) -> (i32, i32) {
    %c0_i32 = arith.constant 0 : i32
    %c0_i32_0 = arith.constant 0 : i32
    return %arg0, %c0_i32 : i32, i32
  }
  func.func @transform_1(%arg0: i32) -> (i32, i32) {
    %c0_i32 = arith.constant 0 : i32
    %c0_i32_0 = arith.constant 0 : i32
    %c0_i32_1 = arith.constant 0 : i32
    return %c0_i32, %c0_i32_0 : i32, i32
  }
  func.func @transform_2(%arg0: i32) -> (i32, i32) {
    %c0_i32 = arith.constant 0 : i32
    %c0_i32_0 = arith.constant 0 : i32
    %c0_i32_1 = arith.constant 0 : i32
    return %c0_i32, %c0_i32_0 : i32, i32
  }
  func.func @transform_3(%arg0: i32) -> (i32, i32) {
    %c0_i32 = arith.constant 0 : i32
    %c0_i32_0 = arith.constant 0 : i32
    %c0_i32_1 = arith.constant 0 : i32
    return %c0_i32, %c0_i32_0 : i32, i32
  }
  func.func @transform_4(%arg0: i32) -> (i32, i32) {
    %c0_i32 = arith.constant 0 : i32
    %c0_i32_0 = arith.constant 0 : i32
    %c0_i32_1 = arith.constant 0 : i32
    return %c0_i32, %c0_i32_0 : i32, i32
  }
  func.func @transform_5(%arg0: i32) -> (i32, i32) {
    %c0_i32 = arith.constant 0 : i32
    %c0_i32_0 = arith.constant 0 : i32
    return %arg0, %c0_i32 : i32, i32
  }
}

</mosaic_0001>

<bundles_post_ra>
// kernel: tpu_custom_call.1
= control target key start
LH: loop header
LB: loop body
LE: loop exit
PB: predicated region body
PF: predicated region fallthrough
CT: control target
= control target key end

     0   :  { %s1622_s0 = inlined_call_operand.hbm [shape: f32[200,128], index: 0, kind: input, shape index: {}]   ;;  %s1623_s1 = inlined_call_operand.hbm [shape: f32[128,128], index: 1, kind: input, shape index: {}]   ;;  %s1624_s2 = inlined_call_operand.vmem [shape: f32[1,128], index: 2, kind: input, shape index: {}]   ;;  %s1625_s3 = inlined_call_operand.hbm [shape: f32[128,128], index: 3, kind: input, shape index: {}]   ;;  %s1626_s4 = inlined_call_operand.vmem [shape: f32[1,128], index: 4, kind: input, shape index: {}]   ;;  %s1627_s5 = inlined_call_operand.hbm [shape: f32[200,128], index: 5, kind: output, shape index: {}]  }
   0x1   :  { %1629 = sst [smem:[#allocation12_spill]] %s1623_s1 }
   0x2   :  { %1630 = sst [smem:[#allocation13_spill]] %s1625_s3 }
   0x3   :  { %10 = vsyncpa [#allocation3], 0 }
   0x4   :  { %12 = vsyncpa [#allocation3 + $0x1], 0 }
   0x5   :  { %13 = vsyncpa [#allocation6], 0 }
   0x6   :  { %14 = vsyncpa [#allocation4], 0 }
   0x7   :  { %16 = vsyncpa [#allocation4 + $0x1], 0  ;;  %s1243_s18 = smov 0   ;;  %s1245_s19 = smov 0  }
   0x8   :  { %s1247_s20 = smov 0   ;;  %s1249_s21 = smov 0  }
   0x9 LB: > { %s1264_s22 = sadd.s32 4294967295, %s1201_s21   ;;  %s827_s23 = sadd.s32 4294967294, %s1201_s21   ;;  %s1201_s21 = sphi %s1249_s21, %s1650_s21   ;;  %s1197_s20 = sphi %s1247_s20, %s1649_s20   ;;  %s1193_s19 = sphi %s1245_s19, %s1648_s19   ;;  %s1189_s18 = sphi %s1243_s18, %s1647_s18  }
   0xa   : > { %s1268_s24 = sadd.s32 1, %s1201_s21   ;;  %s29_s25 = sadd.s32 1, %s1197_s20 }
   0xb   : > { %s26_s26 = ssub.s32 %s1201_s21, %s1268_s24  ;;  %p36_p0 = scmp.ne.s32.totalorder %s1197_s20, %s1193_s19 }
   0xc   : > { %p27_p1 = scmp.eq.s32.totalorder %s26_s26, 0  ;;  %p37_p2 = scmp.eq.s32.totalorder %s1201_s21, 0 }
   0xd   : > { %p42_p3 = scmp.ne.s32.totalorder %s1193_s19, %s1189_s18  ;;  %p1628_p4 = scmp.eq.s32.totalorder %s1264_s22, 0 }
   0xe   : > { %s1280_s27 = scalar_select %p27_p1, %s1197_s20, %s29_s25  }
   0xf   : > { %p1282_p5 = por %p37_p2, %p36_p0  ;;  %p1288_p6 = por %p1628_p4, %p42_p3 }
  0x10   : > { %p150_p7 = scmp.eq.s32.totalorder %s1264_s22, 3  ;;  %p156_p8 = scmp.eq.s32.totalorder %s827_s23, 3 }
  0x11   : > { %p828_p9 = scmp.ge.s32.totalorder %s1201_s21, 1  ;;  %p163_p10 = scmp.lt.s32.totalorder %s1201_s21, 5 }
  0x12   : > { %p1295_p11 = por %p150_p7, %p36_p0  ;;  %p1299_p12 = por %p156_p8, %p42_p3 }
  0x13   : > { %p1303_p13 = pnand %p828_p9, %p163_p10  ;;  %s1636_s1 = sld [smem:[#allocation12_spill]] }
  0x14   : > { %s1634_s6 = scalar_select %p1299_p12, 1, 0 }
  0x15   : > { %p907_p1 = pneg %p1303_p13  ;;  %s1203_s11 = smov [#allocation5]  }
  0x16   : > { %s176_s12 = sshll.u32 %s1203_s11, 4  ;;  %s1637_s3 = sld [smem:[#allocation13_spill]]  ;;  %s177_s12 = int_to_ptr.vmem [resolvable:$true] %s176_s12 }
  0x17   : > { %p908_p0 = pnand %p907_p1, %p1628_p4  ;;  %s1204_s16 = smov 128  }
  0x18   : > { %s1205_s17 = smov 8   ;;  %s1206_s23 = smov [#allocation7]  }
  0x19   : > { %s174_s10 = sshll.u32 %s1636_s1, 4  ;;  %s193_s25 = sshll.u32 %s1206_s23, 4  ;;  %s175_s10 = int_to_ptr.hbm [resolvable:$true] %s174_s10  ;;  %s194_s25 = int_to_ptr.vmem [resolvable:$true] %s193_s25 }
  0x1a   : > { %910 = dma.hbm_to_vmem [thread:$0]  (!%p908_p0), %s175_s10, 2048, %s177_s12, [#allocation6], %s1204_s16, %s1204_s16, %s1205_s17  }
  0x1b   : > { %p831_p2 = scmp.ge.s32.totalorder %s1201_s21, 4 }
  0x1c   : > { %s191_s15 = sshll.u32 %s1637_s3, 4  ;;  %s192_s15 = int_to_ptr.hbm [resolvable:$true] %s191_s15 }
  0x1d   : > { %913 = dma.hbm_to_vmem [thread:$0]  (!%p908_p0), %s192_s15, 2048, %s194_s25, [#allocation6], %s1204_s16, %s1204_s16, %s1205_s17  }
  0x1e   : > { %206 = sbr.rel (%p831_p2) target bundleno = 73 (0x49), region = 32 }
  0x23   : > { %209 = sbr.rel (!%p1282_p5) target bundleno = 73 (0x49), region = 36  ;;  %s210_s26 = sand.u32 (%p1282_p5), 1, %s1197_s20  }
  0x24   : > { %s215_s8 = smul.u32 (%p1282_p5), 7, %s1201_s21  ;;  %s1325_s14 = scalar_lea.sflag (%p1282_p5), [#allocation3], %s210_s26 }
  0x25   : > { %s895_s9 = smul.u32 (%p1282_p5), 56, %s210_s26 }
  0x26   : > { %s216_s11 = ssub.s32 (%p1282_p5), 25, %s215_s8 }
  0x27   : > { %p217_p3 = scmp.lt.s32.totalorder (%p1282_p5), %s216_s11, 7  ;;  %s214_s15 = scalar_lea.vmem (%p1282_p5), [#allocation2], %s895_s9 }
  0x29   : > { %s1652_s11 = smov (!%p217_p3, %s216_s11), 7 }
  0x2a   : > { %s832_s10 = sshll.u32 %s1652_s11, 3 }
  0x2b   : > { %s220_s12 = ssub.s32 56, %s832_s10 }
  0x2c   : > { %s221_s13 = sshll.u32 %s220_s12, 4 }
  0x2d   : > { %222 = vsyncadd %s1325_s14, %s221_s13  ;;  %p1328_p5 = scmp.ne.s32.totalorder %s832_s10, 0  ;;  %s861_s16 = smul.u32 56, %s1201_s21 }
  0x2e   : > { %s1333_s17 = sshll.u32 %s214_s15, 4  ;;  %s836_s23 = sshll.u32 %s1652_s11, 7  ;;  %s230_s17 = int_to_ptr.vmem [resolvable:$true] %s1333_s17 }
  0x2f   : > { %s225_s26 = scalar_lea.hbm %s1622_s0, %s861_s16  ;;  %s1083_s10 = sshrl.u32 %s836_s23, 4 }
  0x30   : > { %s227_s9 = sshll.u32 %s225_s26, 4  ;;  %s1092_s3 = scalar_lea.hbm %s1622_s0, 200  ;;  %s1340_s9 = int_to_ptr.hbm [resolvable:$true] %s227_s9 }
  0x31   : > { %s1081_s12 = sshra.s32 %s1340_s9, 4  ;;  %s1082_s12 = int_to_ptr.hbm [resolvable:$true] %s1081_s12 }
  0x32   : > { %s1088_s13 = scalar_lea.hbm %s1082_s12, %s1083_s10  ;;  %p1093_p10 = scmp.lt.s32.totalorder %s1082_s12, %s1622_s0 }
  0x33   : > { %p1089_p7 = scmp.ne.s32.totalorder %s1082_s12, %s1088_s13  ;;  %p1094_p1 = scmp.lt.s32.totalorder %s1092_s3, %s1088_s13 }
  0x35   : > { %p1090_p8 = pnand %p1089_p7, %p1328_p5  ;;  %p1095_p0 = por %p1094_p1, %p1093_p10 }
  0x37   : > { %p1091_p9 = pneg %p1090_p8 }
  0x39   : > { %p1096_p2 = pnand %p1095_p0, %p1091_p9 }
  0x3b   : > { %1099 = shalt.err (!%p1096_p2)
}
  0x3c   : > { %s1100_s8 = sshra.s32 %s230_s17, 4  ;;  %s1207_s1 = smov [#allocation2]   ;;  %s1101_s8 = int_to_ptr.vmem [resolvable:$true] %s1100_s8 }
  0x3d   : > { %s1107_s26 = scalar_lea.vmem %s1101_s8, %s1083_s10  ;;  %s1111_s15 = scalar_lea.vmem %s1207_s1, 112 }
  0x3e   : > { %p1108_p3 = scmp.ne.s32.totalorder %s1101_s8, %s1107_s26  ;;  %p1113_p4 = scmp.lt.s32.totalorder %s1111_s15, %s1107_s26 }
  0x40   : > { %p1109_p7 = pnand %p1108_p3, %p1328_p5 }
  0x42   : > { %p1110_p8 = pneg %p1109_p7 }
  0x44   : > { %p1115_p12 = pnand %p1113_p4, %p1110_p8 }
  0x46   : > { %1118 = shalt.err (!%p1115_p12)
}
  0x47   : > { %s1208_s12 = smov 128   ;;  %s1209_s3 = smov 8  }
  0x48   : > { %235 = dma.hbm_to_vmem [thread:$0]  (%p1328_p5), %s1340_s9, %s836_s23, %s230_s17, %s1325_s14, %s1208_s12, %s1208_s12, %s1209_s3  }
  0x49 PF: > { %241 = sbr.rel (%p1303_p13) target bundleno = 500 (0x1f4), region = 40  ;;  %s1368_s10 = sand.u32 (!%p1303_p13), 1, %s1193_s19  }
  0x4a   : > { %s896_s13 = smul.u32 (!%p1303_p13), 56, %s1368_s10  ;;  %s244_s25 = scalar_lea.sflag (!%p1303_p13), [#allocation3], %s1368_s10 }
  0x4c   : > { %s1374_s16 = scalar_lea.vmem (!%p1303_p13), [#allocation2], %s896_s13 }
  0x4e   : > { %1176 = dma.done.wait (%p1288_p6), %s244_s25, 896  }
  0x4f   : > { %1178 = vsyncadd (%p1288_p6), %s244_s25, 4294966400  ;;  %p1639_p4 = scmp.eq.s32.totalorder %s1264_s22, 0 }
  0x51   : > { %1180 = dma.done.wait (%p1639_p4), [#allocation6], 4096   ;;  %p1640_p12 = pmov %p1639_p4 }
  0x52   : > { %v317_v0 = vld [vmem:[#allocation5 + $0x78] sm:$0xff]  ;;  %v316_v1 = vld [vmem:[#allocation5 + $0x70] sm:$0xff]  ;;  %v315_v2 = vld [vmem:[#allocation5 + $0x68] sm:$0xff]  ;;  %s1521_s28 = scalar_lea.vmem [#allocation8], %s896_s13  ;;  %s713_s17 = scalar_lea.sflag [#allocation4], %s1368_s10 }
  0x53   : > { %1182 = vsyncadd (%p1640_p12), [#allocation6], 4294963200  ;;  %322 = vmatpush.msra.mxu0 %v317_v0  ;;  %863 = vmatpush.msra.mxu2 %v317_v0  ;;  %v314_v3 = vld [vmem:[#allocation5 + $0x60] sm:$0xff]  ;;  %v313_v4 = vld [vmem:[#allocation5 + $0x58] sm:$0xff]  ;;  %s720_s23 = smul.u32 (%p1295_p11), 7, %s1264_s22 }
  0x54   : > { %v312_v5 = vld [vmem:[#allocation5 + $0x50] sm:$0xff]  ;;  %v311_v6 = vld [vmem:[#allocation5 + $0x48] sm:$0xff]  ;;  %v310_v7 = vld [vmem:[#allocation5 + $0x40] sm:$0xff] }
  0x55   : > { %323 = vmatpush.msra.mxu0 %v316_v1  ;;  %864 = vmatpush.msra.mxu2 %v316_v1  ;;  %v309_v8 = vld [vmem:[#allocation5 + $0x38] sm:$0xff]  ;;  %v308_v9 = vld [vmem:[#allocation5 + $0x30] sm:$0xff]  ;;  %v307_v10 = vld [vmem:[#allocation5 + $0x28] sm:$0xff]  ;;  %s721_s9 = ssub.s32 (%p1295_p11), 25, %s720_s23 }
  0x56   : > { %v306_v11 = vld [vmem:[#allocation5 + $0x20] sm:$0xff]  ;;  %v305_v12 = vld [vmem:[#allocation5 + $0x18] sm:$0xff]  ;;  %v304_v13 = vld [vmem:[#allocation5 + $0x10] sm:$0xff]  ;;  %p722_p6 = scmp.lt.s32.totalorder (%p1295_p11), %s721_s9, 7 }
  0x57   : > { %324 = vmatpush.msra.mxu0 %v315_v2  ;;  %865 = vmatpush.msra.mxu2 %v315_v2  ;;  %v303_v14 = vld [vmem:[#allocation5 + $0x8] sm:$0xff]  ;;  %v302_v15 = vld [vmem:[#allocation5] sm:$0xff]  ;;  %v1393_v18 = vld [vmem:[%s1374_s16 + $0x8] sm:$0xff] }
  0x58   : > { %v1385_v16 = vld [vmem:[%s1374_s16] sm:$0xff]  ;;  %v1388_v17 = vld [vmem:[%s1374_s16 + $0x18] sm:$0xff]  ;;  %v1401_v20 = vld [vmem:[%s1374_s16 + $0x10] sm:$0xff] }
  0x59   : > { %325 = vmatpush.msra.mxu0 %v314_v3  ;;  %866 = vmatpush.msra.mxu2 %v314_v3  ;;  %v1396_v19 = vld [vmem:[%s1374_s16 + $0x20] sm:$0xff]  ;;  %v1404_v21 = vld [vmem:[%s1374_s16 + $0x28] sm:$0xff]  ;;  %v1409_v22 = vld [vmem:[%s1374_s16 + $0x30] sm:$0xff] }
  0x5a   : > { %v515_v23 = vld [vmem:[#allocation7 + $0x78] sm:$0xff]  ;;  %v514_v24 = vld [vmem:[#allocation7 + $0x70] sm:$0xff]  ;;  %v513_v25 = vld [vmem:[#allocation7 + $0x68] sm:$0xff] }
  0x5b   : > { %326 = vmatpush.msra.mxu0 %v313_v4  ;;  %867 = vmatpush.msra.mxu2 %v313_v4  ;;  %v512_v26 = vld [vmem:[#allocation7 + $0x60] sm:$0xff]  ;;  %v511_v27 = vld [vmem:[#allocation7 + $0x58] sm:$0xff]  ;;  %v510_v28 = vld [vmem:[#allocation7 + $0x50] sm:$0xff] }
  0x5c   : > { %520 = vmatpush.msra.mxu1 %v515_v23  ;;  %879 = vmatpush.msra.mxu3 %v515_v23  ;;  %v509_v29 = vld [vmem:[#allocation7 + $0x48] sm:$0xff]  ;;  %v508_v30 = vld [vmem:[#allocation7 + $0x40] sm:$0xff]  ;;  %v507_v31 = vld [vmem:[#allocation7 + $0x38] sm:$0xff] }
  0x5d   : > { %327 = vmatpush.msra.mxu0 %v312_v5  ;;  %868 = vmatpush.msra.mxu2 %v312_v5  ;;  %v506_v32 = vld [vmem:[#allocation7 + $0x30] sm:$0xff]  ;;  %v505_v33 = vld [vmem:[#allocation7 + $0x28] sm:$0xff]  ;;  %v504_v34 = vld [vmem:[#allocation7 + $0x20] sm:$0xff] }
  0x5e   : > { %521 = vmatpush.msra.mxu1 %v514_v24  ;;  %880 = vmatpush.msra.mxu3 %v514_v24  ;;  %v503_v35 = vld [vmem:[#allocation7 + $0x18] sm:$0xff]  ;;  %v502_v36 = vld [vmem:[#allocation7 + $0x10] sm:$0xff]  ;;  %v501_v38 = vld [vmem:[#allocation7 + $0x8] sm:$0xff] }
  0x5f   : > { %328 = vmatpush.msra.mxu0 %v311_v6  ;;  %869 = vmatpush.msra.mxu2 %v311_v6  ;;  %v1415_v37 = vld [vmem:[%s1624_s2] ss:$0 sm:$0xff]  ;;  %v500_v39 = vld [vmem:[#allocation7] sm:$0xff] }
  0x60   : > { %522 = vmatpush.msra.mxu1 %v513_v25  ;;  %881 = vmatpush.msra.mxu3 %v513_v25 }
  0x61   : > { %329 = vmatpush.msra.mxu0 %v310_v7  ;;  %870 = vmatpush.msra.mxu2 %v310_v7 }
  0x62   : > { %523 = vmatpush.msra.mxu1 %v512_v26  ;;  %882 = vmatpush.msra.mxu3 %v512_v26 }
  0x63   : > { %330 = vmatpush.msra.mxu0 %v309_v8  ;;  %871 = vmatpush.msra.mxu2 %v309_v8 }
  0x64   : > { %524 = vmatpush.msra.mxu1 %v511_v27  ;;  %883 = vmatpush.msra.mxu3 %v511_v27 }
  0x65   : > { %331 = vmatpush.msra.mxu0 %v308_v9  ;;  %872 = vmatpush.msra.mxu2 %v308_v9 }
  0x66   : > { %525 = vmatpush.msra.mxu1 %v510_v28  ;;  %884 = vmatpush.msra.mxu3 %v510_v28 }
  0x67   : > { %332 = vmatpush.msra.mxu0 %v307_v10  ;;  %873 = vmatpush.msra.mxu2 %v307_v10 }
  0x68   : > { %526 = vmatpush.msra.mxu1 %v509_v29  ;;  %885 = vmatpush.msra.mxu3 %v509_v29 }
  0x69   : > { %333 = vmatpush.msra.mxu0 %v306_v11  ;;  %874 = vmatpush.msra.mxu2 %v306_v11 }
  0x6a   : > { %527 = vmatpush.msra.mxu1 %v508_v30  ;;  %886 = vmatpush.msra.mxu3 %v508_v30 }
  0x6b   : > { %334 = vmatpush.msra.mxu0 %v305_v12  ;;  %875 = vmatpush.msra.mxu2 %v305_v12 }
  0x6c   : > { %528 = vmatpush.msra.mxu1 %v507_v31  ;;  %887 = vmatpush.msra.mxu3 %v507_v31 }
  0x6d   : > { %335 = vmatpush.msra.mxu0 %v304_v13  ;;  %876 = vmatpush.msra.mxu2 %v304_v13 }
  0x6e   : > { %529 = vmatpush.msra.mxu1 %v506_v32  ;;  %888 = vmatpush.msra.mxu3 %v506_v32 }
  0x6f   : > { %336 = vmatpush.msra.mxu0 %v303_v14  ;;  %877 = vmatpush.msra.mxu2 %v303_v14 }
  0x70   : > { %530 = vmatpush.msra.mxu1 %v505_v33  ;;  %889 = vmatpush.msra.mxu3 %v505_v33 }
  0x71   : > { %337 = vmatpush.msra.mxu0 %v302_v15  ;;  %878 = vmatpush.msra.mxu2 %v302_v15 }
  0x72   : > { %338 = vmatmul.f32.vlgmr.msra.gmra.mxu0 %v1385_v16  ;;  %347 = vmatmul.f32.vlgmr.msra.gmra.mxu2 %v1388_v17 }
  0x73   : > { %531 = vmatpush.msra.mxu1 %v504_v34  ;;  %890 = vmatpush.msra.mxu3 %v504_v34 }
  0x75   : > { %532 = vmatpush.msra.mxu1 %v503_v35  ;;  %891 = vmatpush.msra.mxu3 %v503_v35 }
  0x77   : > { %533 = vmatpush.msra.mxu1 %v502_v36  ;;  %892 = vmatpush.msra.mxu3 %v502_v36 }
  0x79   : > { %534 = vmatpush.msra.mxu1 %v501_v38  ;;  %893 = vmatpush.msra.mxu3 %v501_v38 }
  0x7a   : > { %341 = vmatmul.f32.gmra.mxu0 %v1393_v18  ;;  %350 = vmatmul.f32.gmra.mxu2 %v1396_v19 }
  0x7b   : > { %535 = vmatpush.msra.mxu1 %v500_v39  ;;  %894 = vmatpush.msra.mxu3 %v500_v39 }
  0x82   : > { %344 = vmatmul.f32.gmra.mxu0 %v1401_v20  ;;  %353 = vmatmul.f32.gmra.mxu2 %v1404_v21 }
  0x8a   : > { %356 = vmatmul.f32.gmra.mxu2 %v1409_v22 }
  0xef   : > { %v339_v40 = vpop.f32.mrf.mxu0 }
  0xf0   : > { %v340_v41 = vadd.f32 %v1415_v37, %v339_v40 }
  0xf2   : > { %v840_v42 = vmul.f32 -1.442695, %v340_v41 }
  0xf4   : > { %965 = vpow2.f32 %v840_v42 }
  0xf5   : > { %v348_v43 = vpop.f32.mrf.mxu2 }
  0xf6   : > { %v1419_v44 = vadd.f32 %v1415_v37, %v348_v43 }
  0xf7   : > { %v342_v45 = vpop.f32.mrf.mxu0 }
  0xf8   : > { %v843_v46 = vmul.f32 -1.442695, %v1419_v44  ;;  %v1423_v47 = vadd.f32 %v1415_v37, %v342_v45 }
  0xfa   : > { %v966_v48 = vpop.eup %965  ;;  %967 = vpow2.f32 %v843_v46  ;;  %v841_v49 = vmul.f32 -1.442695, %v1423_v47 }
  0xfb   : > { %v381_v50 = vadd.f32 1.0, %v966_v48 }
  0xfc   : > { %969 = vpow2.f32 %v841_v49 }
  0xfd   : > { %971 = vrcp.f32 %v381_v50  ;;  %v351_v51 = vpop.f32.mrf.mxu2  ;;  %vm393_vm0 = vweird.f32 %v381_v50  ;;  %v399_v0 = vand.u32 2147483648, %v381_v50  ;;  %v397_v3 = vand.u32 2147483647, %v381_v50 }
  0xfe   : > { %v1427_v52 = vadd.f32 %v1415_v37, %v351_v51 }
  0xff   : > { %v345_v53 = vpop.f32.mrf.mxu0  ;;  %v400_v9 = vor.u32 1.1754944e-38, %v399_v0  ;;  %vm398_vm3 = vcmp.eq.f32.partialorder %v397_v3, 8.507059e+37 }
 0x100   : > { %v968_v54 = vpop.eup %967  ;;  %v844_v55 = vmul.f32 -1.442695, %v1427_v52  ;;  %v1431_v56 = vadd.f32 %v1415_v37, %v345_v53 }
 0x101   : > { %v1434_v60 = vadd.f32 1.0, %v968_v54 }
 0x102   : > { %v970_v57 = vpop.eup %969  ;;  %973 = vpow2.f32 %v844_v55  ;;  %v842_v58 = vmul.f32 -1.442695, %v1431_v56 }
 0x103   : > { %v972_v59 = vpop.eup %971  ;;  %v382_v61 = vadd.f32 1.0, %v970_v57 }
 0x104   : > { %975 = vpow2.f32 %v842_v58  ;;  %v389_v62 = vmul.f32 %v972_v59, %v381_v50  ;;  %vm394_vm1 = vweird.f32 %v972_v59 }
 0x105   : > { %977 = vrcp.f32 %v382_v61  ;;  %v354_v63 = vpop.f32.mrf.mxu2  ;;  %vm1443_vm2 = vmor %vm393_vm0, %vm394_vm1  ;;  %vm408_vm4 = vweird.f32 %v382_v61  ;;  %v412_v26 = vand.u32 2147483647, %v382_v61  ;;  %v414_v27 = vand.u32 2147483648, %v382_v61 }
 0x106   : > { %v1437_v1 = vadd.f32 %v1415_v37, %v354_v63  ;;  %v390_v2 = vsub.f32 1.0, %v389_v62  ;;  %979 = vrcp.f32 %v1434_v60  ;;  %vm438_vm0 = vweird.f32 %v1434_v60 }
 0x107   : > { %vm413_vm7 = vcmp.eq.f32.partialorder %v412_v26, 8.507059e+37 }
 0x108   : > { %v974_v4 = vpop.eup %973  ;;  %v845_v5 = vmul.f32 -1.442695, %v1437_v1  ;;  %v391_v6 = vmul.f32 %v972_v59, %v390_v2 }
 0x109   : > { %v1441_v7 = vadd.f32 1.0, %v974_v4 }
 0x10a   : > { %v976_v10 = vpop.eup %975  ;;  %981 = vpow2.f32 %v845_v5  ;;  %v392_v11 = vadd.f32 %v972_v59, %v391_v6 }
 0x10b   : > { %v978_v12 = vpop.eup %977  ;;  %983 = vrcp.f32 %v1441_v7  ;;  %v383_v13 = vadd.f32 1.0, %v976_v10  ;;  %v457_v42 = vand.u32 2147483647, %v1441_v7  ;;  %v459_v43 = vand.u32 2147483648, %v1441_v7 }
 0x10c   : > { %v396_v14 = vsel %vm1443_vm2, %v972_v59, %v392_v11  ;;  %v404_v15 = vmul.f32 %v978_v12, %v382_v61  ;;  %v1450_v23 = vpop.eup %979  ;;  %vm409_vm5 = vweird.f32 %v978_v12  ;;  %vm453_vm11 = vweird.f32 %v1441_v7 }
 0x10d   : > { %985 = vrcp.f32 %v383_v13  ;;  %v357_v24 = vpop.f32.mrf.mxu2  ;;  %v401_v25 = vsel %vm398_vm3, %v400_v9, %v396_v14  ;;  %v434_v34 = vmul.f32 %v1450_v23, %v1434_v60  ;;  %vm1461_vm6 = vmor %vm408_vm4, %vm409_vm5  ;;  %vm423_vm8 = vweird.f32 %v383_v13 }
 0x10e   : > { %v1453_v28 = vadd.f32 %v1415_v37, %v357_v24  ;;  %v493_v29 = vmul.f32 %v401_v25, %v340_v41  ;;  %v405_v30 = vsub.f32 1.0, %v404_v15  ;;  %v415_v37 = vor.u32 1.1754944e-38, %v414_v27 }
 0x10f   : > { %v435_v49 = vsub.f32 1.0, %v434_v34  ;;  %v427_v51 = vand.u32 2147483647, %v383_v13  ;;  %v429_v53 = vand.u32 2147483648, %v383_v13  ;;  %vm458_vm13 = vcmp.eq.f32.partialorder %v457_v42, 8.507059e+37 }
 0x110   : > { %v982_v31 = vpop.eup %981  ;;  %v846_v32 = vmul.f32 -1.442695, %v1453_v28  ;;  %536 = vmatmul.f32.vlgmr.msra.gmra.mxu1 %v493_v29  ;;  %v406_v33 = vmul.f32 %v978_v12, %v405_v30  ;;  %v460_v2 = vor.u32 1.1754944e-38, %v459_v43  ;;  %vm439_vm1 = vweird.f32 %v1450_v23 }
 0x111   : > { %v984_v35 = vpop.eup %983  ;;  %v1458_v36 = vadd.f32 1.0, %v982_v31  ;;  %v436_v62 = vmul.f32 %v1450_v23, %v435_v49  ;;  %v430_v3 = vor.u32 1.1754944e-38, %v429_v53  ;;  %vm428_vm15 = vcmp.eq.f32.partialorder %v427_v51, 8.507059e+37  ;;  %vm440_vm3 = vmor %vm438_vm0, %vm439_vm1 }
 0x112   : > { %987 = vpow2.f32 %v846_v32  ;;  %v407_v39 = vadd.f32 %v978_v12, %v406_v33  ;;  %v449_v40 = vmul.f32 %v984_v35, %v1441_v7  ;;  %vm454_vm9 = vweird.f32 %v984_v35 }
 0x113   : > { %v986_v41 = vpop.eup %985  ;;  %989 = vrcp.f32 %v1458_v36  ;;  %vm455_vm12 = vmor %vm453_vm11, %vm454_vm9  ;;  %v437_v10 = vadd.f32 %v1450_v23, %v436_v62  ;;  %v444_v14 = vand.u32 2147483648, %v1434_v60  ;;  %v472_v25 = vand.u32 2147483647, %v1458_v36 }
 0x114   : > { %v411_v45 = vsel %vm1461_vm6, %v978_v12, %v407_v39  ;;  %v450_v46 = vsub.f32 1.0, %v449_v40  ;;  %v419_v48 = vmul.f32 %v986_v41, %v383_v13  ;;  %vm424_vm10 = vweird.f32 %v986_v41 }
 0x115   : > { %v416_v50 = vsel %vm413_vm7, %v415_v37, %v411_v45  ;;  %vm425_vm14 = vmor %vm423_vm8, %vm424_vm10  ;;  %v474_v12 = vand.u32 2147483648, %v1458_v36  ;;  %v442_v13 = vand.u32 2147483647, %v1434_v60  ;;  %vm468_vm4 = vweird.f32 %v1458_v36 }
 0x116   : > { %v494_v54 = vmul.f32 %v416_v50, %v1423_v47  ;;  %v451_v55 = vmul.f32 %v984_v35, %v450_v46  ;;  %v420_v57 = vsub.f32 1.0, %v419_v48  ;;  %v441_v26 = vsel %vm440_vm3, %v1450_v23, %v437_v10 }
 0x117   : > { %v475_v29 = vor.u32 1.1754944e-38, %v474_v12  ;;  %v445_v30 = vor.u32 1.1754944e-38, %v444_v14  ;;  %vm473_vm6 = vcmp.eq.f32.partialorder %v472_v25, 8.507059e+37  ;;  %vm443_vm7 = vcmp.eq.f32.partialorder %v442_v13, 8.507059e+37 }
 0x118   : > { %v988_v58 = vpop.eup %987  ;;  %539 = vmatmul.f32.gmra.mxu1 %v494_v54  ;;  %v452_v59 = vadd.f32 %v984_v35, %v451_v55  ;;  %v421_v61 = vmul.f32 %v986_v41, %v420_v57 }
 0x119   : > { %v990_v63 = vpop.eup %989  ;;  %v387_v0 = vadd.f32 1.0, %v988_v58  ;;  %v446_v33 = vsel %vm443_vm7, %v445_v30, %v441_v26 }
 0x11a   : > { %v456_v47 = vsel %vm455_vm12, %v984_v35, %v452_v59  ;;  %v422_v4 = vadd.f32 %v986_v41, %v421_v61  ;;  %v464_v5 = vmul.f32 %v990_v63, %v1458_v36  ;;  %vm469_vm2 = vweird.f32 %v990_v63 }
 0x11b   : > { %991 = vrcp.f32 %v387_v0  ;;  %v461_v6 = vsel %vm458_vm13, %v460_v2, %v456_v47  ;;  %vm470_vm5 = vmor %vm468_vm4, %vm469_vm2  ;;  %v489_v35 = vand.u32 2147483648, %v387_v0  ;;  %v496_v38 = vmul.f32 %v446_v33, %v1419_v44 }
 0x11c   : > { %v497_v7 = vmul.f32 %v461_v6, %v1427_v52  ;;  %v426_v8 = vsel %vm425_vm14, %v986_v41, %v422_v4  ;;  %v465_v9 = vsub.f32 1.0, %v464_v5  ;;  %v487_v23 = vand.u32 2147483647, %v387_v0 }
 0x11d   : > { %v431_v11 = vsel %vm428_vm15, %v430_v3, %v426_v8  ;;  %vm483_vm9 = vweird.f32 %v387_v0  ;;  %v490_v39 = vor.u32 1.1754944e-38, %v489_v35 }
 0x11e   : > { %548 = vmatmul.f32.vlgmr.msra.gmra.mxu3 %v497_v7  ;;  %v495_v15 = vmul.f32 %v431_v11, %v1431_v56  ;;  %v466_v24 = vmul.f32 %v990_v63, %v465_v9  ;;  %vm488_vm11 = vcmp.eq.f32.partialorder %v487_v23, 8.507059e+37 }
 0x120   : > { %542 = vmatmul.f32.gmra.mxu1 %v495_v15  ;;  %v467_v52 = vadd.f32 %v990_v63, %v466_v24 }
 0x121   : > { %v992_v27 = vpop.eup %991 }
 0x122   : > { %v471_v31 = vsel %vm470_vm5, %v990_v63, %v467_v52  ;;  %v479_v56 = vmul.f32 %v992_v27, %v387_v0  ;;  %vm484_vm8 = vweird.f32 %v992_v27 }
 0x123   : > { %v476_v32 = vsel %vm473_vm6, %v475_v29, %v471_v31  ;;  %vm485_vm10 = vmor %vm483_vm9, %vm484_vm8 }
 0x124   : > { %v498_v34 = vmul.f32 %v476_v32, %v1437_v1  ;;  %v480_v60 = vsub.f32 1.0, %v479_v56  ;;  %v1495_v1 = vld [vmem:[%s1626_s4] ss:$0 sm:$0xff] }
 0x126   : > { %551 = vmatmul.f32.gmra.mxu3 %v498_v34  ;;  %v481_v36 = vmul.f32 %v992_v27, %v480_v60 }
 0x128   : > { %545 = vmatmul.f32.gmra.mxu1 %v496_v38  ;;  %v482_v37 = vadd.f32 %v992_v27, %v481_v36 }
 0x12a   : > { %v486_v40 = vsel %vm485_vm10, %v992_v27, %v482_v37 }
 0x12b   : > { %v491_v41 = vsel %vm488_vm11, %v490_v39, %v486_v40 }
 0x12c   : > { %v499_v42 = vmul.f32 %v491_v41, %v1453_v28 }
 0x12e   : > { %554 = vmatmul.f32.gmra.mxu3 %v499_v42 }
 0x18d   : > { %v537_v44 = vpop.f32.mrf.mxu1 }
 0x18e   : > { %v538_v43 = vadd.f32 %v1495_v1, %v537_v44 }
 0x190   : > { %v847_v45 = vmul.f32 -1.442695, %v538_v43 }
 0x192   : > { %993 = vpow2.f32 %v847_v45 }
 0x195   : > { %v540_v46 = vpop.f32.mrf.mxu1 }
 0x196   : > { %v1499_v48 = vadd.f32 %v1495_v1, %v540_v46 }
 0x198   : > { %v994_v49 = vpop.eup %993  ;;  %v848_v50 = vmul.f32 -1.442695, %v1499_v48 }
 0x199   : > { %v579_v51 = vadd.f32 1.0, %v994_v49 }
 0x19a   : > { %995 = vpow2.f32 %v848_v50 }
 0x19b   : > { %997 = vrcp.f32 %v579_v51  ;;  %v595_v2 = vand.u32 2147483647, %v579_v51  ;;  %v597_v3 = vand.u32 2147483648, %v579_v51  ;;  %vm591_vm13 = vweird.f32 %v579_v51 }
 0x19d   : > { %v543_v28 = vpop.f32.mrf.mxu1  ;;  %v598_v10 = vor.u32 1.1754944e-38, %v597_v3  ;;  %vm596_vm15 = vcmp.eq.f32.partialorder %v595_v2, 8.507059e+37 }
 0x19e   : > { %v1503_v53 = vadd.f32 %v1495_v1, %v543_v28 }
 0x1a0   : > { %v996_v54 = vpop.eup %995  ;;  %v849_v55 = vmul.f32 -1.442695, %v1503_v53 }
 0x1a1   : > { %v998_v57 = vpop.eup %997  ;;  %v580_v58 = vadd.f32 1.0, %v996_v54  ;;  %v549_v59 = vpop.f32.mrf.mxu3 }
 0x1a2   : > { %v587_v61 = vmul.f32 %v998_v57, %v579_v51  ;;  %999 = vpow2.f32 %v849_v55  ;;  %v1507_v62 = vadd.f32 %v1495_v1, %v549_v59  ;;  %vm592_vm12 = vweird.f32 %v998_v57 }
 0x1a3   : > { %1001 = vrcp.f32 %v580_v58  ;;  %vm593_vm14 = vmor %vm591_vm13, %vm592_vm12  ;;  %v610_v27 = vand.u32 2147483647, %v580_v58  ;;  %v612_v29 = vand.u32 2147483648, %v580_v58  ;;  %vm606_vm1 = vweird.f32 %v580_v58 }
 0x1a4   : > { %v588_v63 = vsub.f32 1.0, %v587_v61  ;;  %v851_v0 = vmul.f32 -1.442695, %v1507_v62 }
 0x1a5   : > { %v546_v47 = vpop.f32.mrf.mxu1  ;;  %v613_v35 = vor.u32 1.1754944e-38, %v612_v29  ;;  %vm611_vm3 = vcmp.eq.f32.partialorder %v610_v27, 8.507059e+37 }
 0x1a6   : > { %v589_v4 = vmul.f32 %v998_v57, %v588_v63  ;;  %1003 = vpow2.f32 %v851_v0  ;;  %v1511_v5 = vadd.f32 %v1495_v1, %v546_v47 }
 0x1a8   : > { %v1000_v6 = vpop.eup %999  ;;  %v590_v7 = vadd.f32 %v998_v57, %v589_v4  ;;  %v850_v8 = vmul.f32 -1.442695, %v1511_v5 }
 0x1a9   : > { %v1002_v9 = vpop.eup %1001  ;;  %v581_v11 = vadd.f32 1.0, %v1000_v6  ;;  %v552_v12 = vpop.f32.mrf.mxu3 }
 0x1aa   : > { %v594_v13 = vsel %vm593_vm14, %v998_v57, %v590_v7  ;;  %v602_v14 = vmul.f32 %v1002_v9, %v580_v58  ;;  %1005 = vpow2.f32 %v850_v8  ;;  %v1515_v26 = vadd.f32 %v1495_v1, %v552_v12 }
 0x1ab   : > { %v599_v15 = vsel %vm596_vm15, %v598_v10, %v594_v13  ;;  %1007 = vrcp.f32 %v581_v11  ;;  %vm607_vm0 = vweird.f32 %v1002_v9  ;;  %v627_v45 = vand.u32 2147483648, %v581_v11 }
 0x1ac   : > { %v1004_v24 = vpop.eup %1003  ;;  %v691_v25 = vmul.f32 %v599_v15, %v538_v43  ;;  %v603_v52 = vsub.f32 1.0, %v602_v14  ;;  %v852_v32 = vmul.f32 -1.442695, %v1515_v26  ;;  %vm608_vm2 = vmor %vm606_vm1, %vm607_vm0  ;;  %v625_v43 = vand.u32 2147483647, %v581_v11 }
 0x1ad   : > { %v583_v30 = vadd.f32 1.0, %v1004_v24  ;;  %vm621_vm5 = vweird.f32 %v581_v11  ;;  %v628_v57 = vor.u32 1.1754944e-38, %v627_v45 }
 0x1ae   : > { %v698_v31 = vadd.f32 %v691_v25, %v1385_v16  ;;  %v604_v56 = vmul.f32 %v1002_v9, %v603_v52  ;;  %vm626_vm7 = vcmp.eq.f32.partialorder %v625_v43, 8.507059e+37 }
 0x1af   : > { %1009 = vrcp.f32 %v583_v30  ;;  %v657_v58 = vand.u32 2147483648, %v583_v30  ;;  %vm651_vm9 = vweird.f32 %v583_v30 }
 0x1b0   : > { %v1006_v33 = vpop.eup %1005  ;;  %705 = vst [vmem:[%s1521_s28] sm:$0xff] %v698_v31  ;;  %v605_v34 = vadd.f32 %v1002_v9, %v604_v56  ;;  %1011 = vpow2.f32 %v852_v32 }
 0x1b1   : > { %v1008_v60 = vpop.eup %1007  ;;  %v1524_v38 = vadd.f32 1.0, %v1006_v33  ;;  %v555_v16 = vpop.f32.mrf.mxu3  ;;  %v658_v4 = vor.u32 1.1754944e-38, %v657_v58 }
 0x1b2   : > { %v609_v36 = vsel %vm608_vm2, %v1002_v9, %v605_v34  ;;  %v617_v23 = vmul.f32 %v1008_v60, %v581_v11  ;;  %v1527_v37 = vadd.f32 %v1495_v1, %v555_v16  ;;  %vm622_vm4 = vweird.f32 %v1008_v60 }
 0x1b3   : > { %v614_v39 = vsel %vm611_vm3, %v613_v35, %v609_v36  ;;  %1013 = vrcp.f32 %v1524_v38  ;;  %vm623_vm6 = vmor %vm621_vm5, %vm622_vm4  ;;  %v640_v6 = vand.u32 2147483647, %v1524_v38  ;;  %v642_v7 = vand.u32 2147483648, %v1524_v38 }
 0x1b4   : > { %v692_v40 = vmul.f32 %v614_v39, %v1499_v48  ;;  %v618_v41 = vsub.f32 1.0, %v617_v23  ;;  %v853_v42 = vmul.f32 -1.442695, %v1527_v37  ;;  %v655_v48 = vand.u32 2147483647, %v583_v30 }
 0x1b5   : > { %v1010_v44 = vpop.eup %1009  ;;  %vm636_vm13 = vweird.f32 %v1524_v38  ;;  %v643_v24 = vor.u32 1.1754944e-38, %v642_v7  ;;  %vm641_vm15 = vcmp.eq.f32.partialorder %v640_v6, 8.507059e+37 }
 0x1b6   : > { %v1012_v46 = vpop.eup %1011  ;;  %v699_v49 = vadd.f32 %v692_v40, %v1393_v18  ;;  %v619_v50 = vmul.f32 %v1008_v60, %v618_v41  ;;  %v647_v51 = vmul.f32 %v1010_v44, %v583_v30  ;;  %1015 = vpow2.f32 %v853_v42 }
 0x1b7   : > { %v1533_v1 = vadd.f32 1.0, %v1012_v46  ;;  %vm652_vm8 = vweird.f32 %v1010_v44  ;;  %vm656_vm10 = vcmp.eq.f32.partialorder %v655_v48, 8.507059e+37 }
 0x1b8   : > { %706 = vst [vmem:[%s1521_s28 + $0x8] sm:$0xff] %v699_v49  ;;  %v620_v28 = vadd.f32 %v1008_v60, %v619_v50  ;;  %v648_v54 = vsub.f32 1.0, %v647_v51  ;;  %vm653_vm11 = vmor %vm651_vm9, %vm652_vm8 }
 0x1b9   : > { %v1014_v55 = vpop.eup %1013  ;;  %1017 = vrcp.f32 %v1533_v1  ;;  %v672_v29 = vand.u32 2147483648, %v1533_v1  ;;  %v670_v31 = vand.u32 2147483647, %v1533_v1  ;;  %vm666_vm1 = vweird.f32 %v1533_v1 }
 0x1ba   : > { %v624_v59 = vsel %vm623_vm6, %v1008_v60, %v620_v28  ;;  %v649_v18 = vmul.f32 %v1010_v44, %v648_v54  ;;  %v632_v61 = vmul.f32 %v1014_v55, %v1524_v38  ;;  %vm637_vm12 = vweird.f32 %v1014_v55 }
 0x1bb   : > { %v629_v63 = vsel %vm626_vm7, %v628_v57, %v624_v59  ;;  %vm638_vm14 = vmor %vm636_vm13, %vm637_vm12  ;;  %v673_v33 = vor.u32 1.1754944e-38, %v672_v29  ;;  %vm671_vm3 = vcmp.eq.f32.partialorder %v670_v31, 8.507059e+37 }
 0x1bc   : > { %v693_v0 = vmul.f32 %v629_v63, %v1503_v53  ;;  %v650_v2 = vadd.f32 %v1010_v44, %v649_v18  ;;  %v633_v3 = vsub.f32 1.0, %v632_v61  ;;  %v1016_v47 = vpop.eup %1015 }
 0x1bd   : > { %v585_v11 = vadd.f32 1.0, %v1016_v47 }
 0x1be   : > { %v700_v8 = vadd.f32 %v693_v0, %v1401_v20  ;;  %v654_v9 = vsel %vm653_vm11, %v1010_v44, %v650_v2  ;;  %v634_v10 = vmul.f32 %v1014_v55, %v633_v3 }
 0x1bf   : > { %v1018_v12 = vpop.eup %1017  ;;  %v659_v53 = vsel %vm656_vm10, %v658_v4, %v654_v9  ;;  %1019 = vrcp.f32 %v585_v11  ;;  %v687_v16 = vand.u32 2147483648, %v585_v11  ;;  %v685_v23 = vand.u32 2147483647, %v585_v11 }
 0x1c0   : > { %707 = vst [vmem:[%s1521_s28 + $0x10] sm:$0xff] %v700_v8  ;;  %v695_v13 = vmul.f32 %v659_v53, %v1507_v62  ;;  %v635_v14 = vadd.f32 %v1014_v55, %v634_v10  ;;  %v662_v15 = vmul.f32 %v1018_v12, %v1533_v1  ;;  %vm667_vm0 = vweird.f32 %v1018_v12 }
 0x1c1   : > { %vm668_vm2 = vmor %vm666_vm1, %vm667_vm0  ;;  %vm681_vm5 = vweird.f32 %v585_v11  ;;  %v688_v40 = vor.u32 1.1754944e-38, %v687_v16  ;;  %vm686_vm7 = vcmp.eq.f32.partialorder %v685_v23, 8.507059e+37 }
 0x1c2   : > { %v702_v25 = vadd.f32 %v695_v13, %v1396_v19  ;;  %v639_v20 = vsel %vm638_vm14, %v1014_v55, %v635_v14  ;;  %v663_v52 = vsub.f32 1.0, %v662_v15 }
 0x1c3   : > { %v644_v27 = vsel %vm641_vm15, %v643_v24, %v639_v20 }
 0x1c4   : > { %709 = vst [vmem:[%s1521_s28 + $0x20] sm:$0xff] %v702_v25  ;;  %v694_v62 = vmul.f32 %v644_v27, %v1511_v5  ;;  %v664_v30 = vmul.f32 %v1018_v12, %v663_v52 }
 0x1c5   : > { %v1020_v19 = vpop.eup %1019 }
 0x1c6   : > { %v701_v56 = vadd.f32 %v694_v62, %v1388_v17  ;;  %v665_v32 = vadd.f32 %v1018_v12, %v664_v30  ;;  %v677_v60 = vmul.f32 %v1020_v19, %v585_v11  ;;  %vm682_vm4 = vweird.f32 %v1020_v19 }
 0x1c7   : > { %vm683_vm6 = vmor %vm681_vm5, %vm682_vm4 }
 0x1c8   : > { %708 = vst [vmem:[%s1521_s28 + $0x18] sm:$0xff] %v701_v56  ;;  %v669_v34 = vsel %vm668_vm2, %v1018_v12, %v665_v32  ;;  %v678_v38 = vsub.f32 1.0, %v677_v60 }
 0x1c9   : > { %v674_v35 = vsel %vm671_vm3, %v673_v33, %v669_v34 }
 0x1ca   : > { %v696_v5 = vmul.f32 %v674_v35, %v1515_v26  ;;  %v679_v36 = vmul.f32 %v1020_v19, %v678_v38 }
 0x1cc   : > { %v703_v17 = vadd.f32 %v696_v5, %v1404_v21  ;;  %v680_v39 = vadd.f32 %v1020_v19, %v679_v36 }
 0x1ce   : > { %710 = vst [vmem:[%s1521_s28 + $0x28] sm:$0xff] %v703_v17  ;;  %v684_v41 = vsel %vm683_vm6, %v1020_v19, %v680_v39 }
 0x1cf   : > { %v689_v42 = vsel %vm686_vm7, %v688_v40, %v684_v41 }
 0x1d0   : > { %v697_v44 = vmul.f32 %v689_v42, %v1527_v37  ;;  %719 = sbr.rel (!%p1295_p11) target bundleno = 500 (0x1f4), region = 56 }
 0x1d2   : > { %v704_v26 = vadd.f32 %v697_v44, %v1409_v22 }
 0x1d4   : > { %711 = vst [vmem:[%s1521_s28 + $0x30] sm:$0xff] %v704_v26 }
 0x1d5   : > { %s1654_s9 = smov (!%p722_p6, %s721_s9), 7 }
 0x1d6   : > { %s854_s8 = sshll.u32 %s1654_s9, 3 }
 0x1d7   : > { %s725_s26 = ssub.s32 56, %s854_s8 }
 0x1d8   : > { %s726_s1 = sshll.u32 %s725_s26, 4 }
 0x1d9   : > { %727 = vsyncadd %s713_s17, %s726_s1  ;;  %p1569_p13 = scmp.ne.s32.totalorder %s854_s8, 0  ;;  %s862_s15 = smul.u32 56, %s1264_s22 }
 0x1da   : > { %s732_s12 = sshll.u32 %s1521_s28, 4  ;;  %s858_s3 = sshll.u32 %s1654_s9, 7  ;;  %s1579_s12 = int_to_ptr.vmem [resolvable:$true] %s732_s12 }
 0x1db   : > { %s730_s16 = scalar_lea.hbm %s1627_s5, %s862_s15  ;;  %s1120_s7 = sshra.s32 %s1579_s12, 4  ;;  %s1121_s7 = int_to_ptr.vmem [resolvable:$true] %s1120_s7 }
 0x1dc   : > { %s734_s29 = sshll.u32 %s730_s16, 4  ;;  %s1122_s11 = sshrl.u32 %s858_s3, 4  ;;  %s1581_s29 = int_to_ptr.hbm [resolvable:$true] %s734_s29 }
 0x1dd   : > { %s1127_s14 = scalar_lea.vmem %s1121_s7, %s1122_s11  ;;  %s1210_s22 = smov [#allocation8]  }
 0x1de   : > { %p1128_p11 = scmp.ne.s32.totalorder %s1121_s7, %s1127_s14  ;;  %s1131_s28 = scalar_lea.vmem %s1210_s22, 112 }
 0x1df   : > { %p1133_p10 = scmp.lt.s32.totalorder %s1131_s28, %s1127_s14 }
 0x1e0   : > { %p1129_p5 = pnand %p1128_p11, %p1569_p13 }
 0x1e2   : > { %p1130_p9 = pneg %p1129_p5 }
 0x1e4   : > { %p1135_p1 = pnand %p1133_p10, %p1130_p9 }
 0x1e6   : > { %1138 = shalt.err (!%p1135_p1)
}
 0x1e7   : > { %s1139_s23 = sshra.s32 %s1581_s29, 4  ;;  %s1150_s15 = scalar_lea.hbm %s1627_s5, 200  ;;  %s1140_s23 = int_to_ptr.hbm [resolvable:$true] %s1139_s23 }
 0x1e8   : > { %s1146_s8 = scalar_lea.hbm %s1140_s23, %s1122_s11  ;;  %p1151_p7 = scmp.lt.s32.totalorder %s1140_s23, %s1627_s5 }
 0x1e9   : > { %p1147_p0 = scmp.ne.s32.totalorder %s1140_s23, %s1146_s8  ;;  %p1152_p8 = scmp.lt.s32.totalorder %s1150_s15, %s1146_s8 }
 0x1eb   : > { %p1148_p2 = pnand %p1147_p0, %p1569_p13  ;;  %p1153_p4 = por %p1152_p8, %p1151_p7 }
 0x1ed   : > { %p1149_p3 = pneg %p1148_p2 }
 0x1ef   : > { %p1154_p12 = pnand %p1153_p4, %p1149_p3 }
 0x1f1   : > { %1157 = shalt.err (!%p1154_p12)
}
 0x1f2   : > { %s1211_s16 = smov 128   ;;  %s1212_s7 = smov 8  }
 0x1f3   : > { %740 = dma.vmem_to_hbm [thread:$0]  (%p1569_p13), %s1579_s12, %s858_s3, %s1581_s29, %s713_s17, %s1211_s16, %s1211_s16, %s1212_s7  }
 0x1f4 PF: > { %p922_p6 = scmp.ge.s32.totalorder %s1201_s21, 2  ;;  %s749_s11 = sand.u32 1, %s1189_s18  }
 0x1f5   : > { %p1646_p11 = scmp.ne.s32.totalorder %s1634_s6, 0  ;;  %s750_s14 = scalar_lea.sflag [#allocation4], %s749_s11 }
 0x1f7   : > { %p915_p5 = pnand %p922_p6, %p1646_p11 }
 0x1f9   : > { %p916_p9 = pneg %p915_p5 }
 0x1fb   : > { %1184 = dma.done.wait (%p916_p9), %s750_s14, 896  }
 0x1fc   : > { %1186 = vsyncadd (%p916_p9), %s750_s14, 4294966400  ;;  %p19_p10 = scmp.ge.s32.totalorder %s1268_s24, 6   ;;  %s1647_s18 = smov %s1193_s19 }
 0x1fd   : > { %s1648_s19 = smov %s1197_s20  ;;  %s1649_s20 = smov %s1280_s27 }
 0x1fe   : > { %s1650_s21 = smov %s1268_s24  ;;  %21 = sbr.rel (!%p19_p10) target bundleno = 9 (0x9), region = 93 }
 0x203   :  { %756 = vsyncpa [#allocation3], 1 }
 0x204   :  { %758 = vsyncpa [#allocation3 + $0x1], 1 }
 0x205   :  { %759 = vsyncpa [#allocation6], 1 }
 0x206   :  { %760 = vsyncpa [#allocation4], 1 }
 0x207   :  { %762 = vsyncpa [#allocation4 + $0x1], 1 }

</bundles_post_ra>
